<compile_context>
chip_gen: v7x
topology: tpu7x:2x2x1
jax: 0.10.0
libtpu: 0.0.40
codegen_flags: <defaults>
</compile_context>

<pallas_src>
import jax
import jax.numpy as jnp
from jax.experimental import pallas as pl
from jax.experimental.pallas import tpu as pltpu

_MIB = 1024 * 1024


def _round_up(a, b):
    return ((a + b - 1) // b) * b


# ---------------------------------------------------------------------------
# Kernels
# ---------------------------------------------------------------------------

def _bt_dense_kernel(x_ref, scale_ref, mat_ref, bias_ref, o_ref):
    """Fused BN-affine -> dense (block-diag) matmul -> +bias' -> tanh -> +x."""
    xs = (x_ref[...].astype(jnp.float32) * scale_ref[...]).astype(mat_ref.dtype)
    y = jnp.dot(xs, mat_ref[...], preferred_element_type=jnp.float32)
    o = jnp.tanh(y + bias_ref[...])
    # Residual re-reads x (cheap VMEM vld) instead of keeping an f32 copy live across the MXU op.
    o_ref[...] = (o + x_ref[...].astype(jnp.float32)).astype(o_ref.dtype)


def _bt_blockdiag_kernel(x_ref, scale_ref, w_ref, bias_ref, o_ref):
    """Per-partition variant: extra grid axis over partitions, (tile_b, d) @ (d, d)."""
    xs = (x_ref[...].astype(jnp.float32) * scale_ref[0]).astype(w_ref.dtype)
    y = jnp.dot(xs, w_ref[0], preferred_element_type=jnp.float32)
    o = jnp.tanh(y + bias_ref[0])
    o_ref[...] = (o + x_ref[...].astype(jnp.float32)).astype(o_ref.dtype)


# ---------------------------------------------------------------------------
# Tile sizing / VMEM accounting
# ---------------------------------------------------------------------------

def _vmem_estimate(tile_b, feat_w, stream_itemsize, weight_block_bytes):
    streamed = 2 * tile_b * feat_w * stream_itemsize          # double-buffered x + out tiles
    resident = 2 * weight_block_bytes + 4 * 2 * feat_w * 4    # weights + scale/bias (2-buffered)
    interm = 4 * tile_b * feat_w * 4                          # f32 intermediates / scratch headroom
    return streamed + resident + interm


def _pick_tile_b(B, feat_w, stream_itemsize, weight_block_bytes):
    # Target ~4 MiB of streamed x+out per grid step (amortizes the ~0.35 us/step overhead).
    stream_budget = 4 * _MIB
    tile_b = stream_budget // (feat_w * stream_itemsize)
    tile_b = max(8, min(4096, (tile_b // 8) * 8))
    tile_b = min(tile_b, _round_up(B, 8))
    # Keep >=2 steps on the (parallel) batch axis so both v7x TensorCores get work.
    if B > 16:
        tile_b = min(tile_b, max(8, _round_up(-(-B // 2), 8)))
    # Shrink until the estimated working set fits comfortably below the 48 MiB VMEM cap.
    while (_vmem_estimate(tile_b, feat_w, stream_itemsize, weight_block_bytes) > 40 * _MIB
           and tile_b > 8):
        tile_b = max(8, ((tile_b // 2) // 8) * 8)
    return tile_b


# ---------------------------------------------------------------------------
# Wrapper
# ---------------------------------------------------------------------------

def better_transformer(x, weights, bias, gamma, beta, running_mean, running_var,
                       *, eps=1e-5, tile_b=None, matmul_dtype=jnp.bfloat16):
    """y = tanh(BN(x) @ block_diag(*weights) + bias) + x, with x of shape (B, F)."""
    B, F = x.shape
    P, d, d2 = weights.shape
    assert d == d2 and P * d == F, "in_size must equal n_partitions * int_dim"
    f32 = jnp.float32

    # ---- parameter-only preprocessing (tiny, once per call; never touches streamed x) ----
    inv_std = jax.lax.rsqrt(running_var.astype(f32) + eps)
    scale = gamma.astype(f32) * inv_std                                   # (F,)
    shift = beta.astype(f32) - running_mean.astype(f32) * scale           # (F,)
    # Fold the BN shift through the block-diagonal matmul: bias' = shift @ blkdiag(W) + bias.
    bias_f = (jnp.einsum('pd,pde->pe', shift.reshape(P, d), weights.astype(f32),
                         precision=jax.lax.Precision.HIGHEST).reshape(F)
              + bias.astype(f32))

    x_itemsize = jnp.dtype(x.dtype).itemsize
    stream_itemsize = 2 * x_itemsize                  # x in + out tile (same dtype)
    w_itemsize = jnp.dtype(matmul_dtype).itemsize

    structured = (d % 128 == 0)   # lane-aligned partitions -> skip the zero blocks entirely

    if structured:
        # ---- block-diag structure exploited: per-partition (tile_b, d) @ (d, d) matmuls ----
        feat_w = d
        weight_block_bytes = d * d * w_itemsize
        if tile_b is None:
            tile_b = _pick_tile_b(B, feat_w, stream_itemsize, weight_block_bytes)
        else:
            tile_b = max(8, _round_up(min(tile_b, _round_up(B, 8)), 8))
        vmem_est = _vmem_estimate(tile_b, feat_w, stream_itemsize, weight_block_bytes)
        vmem_limit = int(min(48 * _MIB, max(vmem_est + 8 * _MIB, 16 * _MIB)))

        w_b = weights.astype(matmul_dtype)            # (P, d, d), bf16 by default
        scale_p = scale.reshape(P, 1, d)
        bias_p = bias_f.reshape(P, 1, d)
        grid = (pl.cdiv(B, tile_b), P)

        return pl.pallas_call(
            _bt_blockdiag_kernel,
            out_shape=jax.ShapeDtypeStruct((B, F), x.dtype),
            grid=grid,
            in_specs=[
                pl.BlockSpec((tile_b, d), lambda i, p: (i, p)),    # x (streamed per (row, part))
                pl.BlockSpec((1, 1, d), lambda i, p: (p, 0, 0)),   # BN scale[p]
                pl.BlockSpec((1, d, d), lambda i, p: (p, 0, 0)),   # weights[p]
                pl.BlockSpec((1, 1, d), lambda i, p: (p, 0, 0)),   # folded bias[p]
            ],
            out_specs=pl.BlockSpec((tile_b, d), lambda i, p: (i, p)),
            compiler_params=pltpu.CompilerParams(
                dimension_semantics=("parallel", "arbitrary"),
                vmem_limit_bytes=vmem_limit,
            ),
        )(x, scale_p, w_b, bias_p)

    # ---- dense fallback (d < 128: zero blocks are lane-sparse, dense matrix is cheap) ----
    F_pad = _round_up(F, 128)
    eye = jnp.eye(P, dtype=f32)
    # mat[p*d+i, q*d+j] = weights[p, i, j] * (p == q)   == torch.block_diag(*weights)
    mat = (weights.astype(f32)[:, :, None, :] * eye[:, None, :, None]).reshape(F, F)
    if F_pad != F:
        # Zero-pad features so the output block stays lane-dense (avoids masked vst stores).
        x_in = jnp.pad(x, ((0, 0), (0, F_pad - F)))
        mat = jnp.pad(mat, ((0, F_pad - F), (0, F_pad - F)))
        scale_in = jnp.pad(scale, (0, F_pad - F))
        bias_in = jnp.pad(bias_f, (0, F_pad - F))
    else:
        x_in, scale_in, bias_in = x, scale, bias_f
    mat = mat.astype(matmul_dtype)

    feat_w = F_pad
    weight_block_bytes = F_pad * F_pad * w_itemsize
    if tile_b is None:
        tile_b = _pick_tile_b(B, feat_w, stream_itemsize, weight_block_bytes)
    else:
        tile_b = max(8, _round_up(min(tile_b, _round_up(B, 8)), 8))
    vmem_est = _vmem_estimate(tile_b, feat_w, stream_itemsize, weight_block_bytes)
    vmem_limit = int(min(48 * _MIB, max(vmem_est + 8 * _MIB, 16 * _MIB)))

    grid = (pl.cdiv(B, tile_b),)
    out = pl.pallas_call(
        _bt_dense_kernel,
        out_shape=jax.ShapeDtypeStruct((B, F_pad), x.dtype),
        grid=grid,
        in_specs=[
            pl.BlockSpec((tile_b, F_pad), lambda i: (i, 0)),   # x (streamed over batch)
            pl.BlockSpec((1, F_pad), lambda i: (0, 0)),        # BN scale   (resident)
            pl.BlockSpec((F_pad, F_pad), lambda i: (0, 0)),    # block-diag matrix (resident, bf16)
            pl.BlockSpec((1, F_pad), lambda i: (0, 0)),        # folded bias (resident)
        ],
        out_specs=pl.BlockSpec((tile_b, F_pad), lambda i: (i, 0)),
        compiler_params=pltpu.CompilerParams(
            dimension_semantics=("parallel",),
            vmem_limit_bytes=vmem_limit,
        ),
    )(x_in, scale_in.reshape(1, F_pad), mat, bias_in.reshape(1, F_pad))
    return out[:, :F] if F_pad != F else out


# ---------------------------------------------------------------------------
# Self-test
# ---------------------------------------------------------------------------

if __name__ == "__main__":
    key = jax.random.PRNGKey(0)

    def make_inputs(k, batch, in_size, n_partitions):
        int_dim = in_size // n_partitions
        k1, k2, k3, k4, k5, k6, k7 = jax.random.split(k, 7)
        x = jax.random.normal(k1, (batch, in_size), dtype=jnp.float32)
        wbound = 1.0 / (int_dim ** 0.5)   # kaiming_uniform(a=sqrt(5)) bound == 1/sqrt(fan_in)
        weights = jax.random.uniform(k2, (n_partitions, int_dim, int_dim),
                                     minval=-wbound, maxval=wbound, dtype=jnp.float32)
        bias = jax.random.uniform(k3, (in_size,), minval=-wbound, maxval=wbound,
                                  dtype=jnp.float32)
        gamma = 1.0 + 0.1 * jax.random.normal(k4, (in_size,), dtype=jnp.float32)
        beta = 0.1 * jax.random.normal(k5, (in_size,), dtype=jnp.float32)
        running_mean = 0.1 * jax.random.normal(k6, (in_size,), dtype=jnp.float32)
        running_var = jax.random.uniform(k7, (in_size,), minval=0.5, maxval=1.5,
                                         dtype=jnp.float32)
        return x, weights, bias, gamma, beta, running_mean, running_var

    def reference(x, weights, bias, gamma, beta, running_mean, running_var, eps):
        B, F = x.shape
        P, d, _ = weights.shape
        x_norm = (x - running_mean) / jnp.sqrt(running_var + eps) * gamma + beta
        xr = x_norm.reshape(B, P, d)
        o = jnp.tanh(jnp.einsum('bpd,pde->bpe', xr, weights,
                                precision=jax.lax.Precision.HIGHEST).reshape(B, F) + bias)
        return o + x

    eps = 1e-5
    # Case 1: int_dim < 128  -> dense block-diag path (toy module shape).
    # Case 2: int_dim % 128 == 0 -> structured per-partition path, ragged batch.
    cases = [
        dict(batch=64, in_size=128, n_partitions=4),
        dict(batch=52, in_size=256, n_partitions=2),
    ]
    for cfg in cases:
        key, sub = jax.random.split(key)
        args = make_inputs(sub, cfg["batch"], cfg["in_size"], cfg["n_partitions"])
        y_ref = reference(*args, eps)

        # f32 matmul path: exact-semantics check.
        y32 = jax.block_until_ready(
            better_transformer(*args, eps=eps, matmul_dtype=jnp.float32))
        assert y32.shape == args[0].shape and y32.dtype == args[0].dtype
        assert jnp.allclose(y32, y_ref, atol=1e-3, rtol=1e-3), \
            f"f32 path max abs err = {jnp.max(jnp.abs(y32 - y_ref))} (cfg={cfg})"

        # bf16 matmul path (default, MXU-friendly): looser tolerance, f32 accumulation.
        ybf = jax.block_until_ready(better_transformer(*args, eps=eps))
        assert ybf.shape == args[0].shape and ybf.dtype == args[0].dtype
        assert jnp.allclose(ybf, y_ref, atol=2e-2, rtol=2e-2), \
            f"bf16 path max abs err = {jnp.max(jnp.abs(ybf - y_ref))} (cfg={cfg})"

    print("KERNEL_OK")
</pallas_src>

<mosaic_0001>
module attributes {stable_mosaic.version = 11 : i64} {
  func.func @_bt_dense_kernel(%arg0: i32, %arg1: memref<32x128xf32, #tpu.memory_space<vmem>>, %arg2: memref<1x128xf32, #tpu.memory_space<vmem>>, %arg3: memref<128x128xf32, #tpu.memory_space<vmem>>, %arg4: memref<1x128xf32, #tpu.memory_space<vmem>>, %arg5: memref<32x128xf32, #tpu.memory_space<vmem>>) attributes {dimension_semantics = [#tpu.dimension_semantics<parallel>], iteration_bounds = array<i64: 2>, scalar_prefetch = 0 : i64, scratch_operands = 0 : i64, tpu.core_type = #tpu.core_type<tc>, window_params = [{transform_indices = @transform_0, window_bounds = array<i64: 32, 128>}, {pipeline_mode = #tpu.pipeline_mode<synchronous>, transform_indices = @transform_1, window_bounds = array<i64: 1, 128>}, {pipeline_mode = #tpu.pipeline_mode<synchronous>, transform_indices = @transform_2, window_bounds = array<i64: 128, 128>}, {pipeline_mode = #tpu.pipeline_mode<synchronous>, transform_indices = @transform_3, window_bounds = array<i64: 1, 128>}, {transform_indices = @transform_4, window_bounds = array<i64: 32, 128>}]} {
    %c0 = arith.constant 0 : index
    %c0_0 = arith.constant 0 : index
    %0 = vector.load %arg1[%c0, %c0_0] : memref<32x128xf32, #tpu.memory_space<vmem>>, vector<32x128xf32>
    %c0_1 = arith.constant 0 : index
    %c0_2 = arith.constant 0 : index
    %1 = vector.load %arg2[%c0_1, %c0_2] : memref<1x128xf32, #tpu.memory_space<vmem>>, vector<1x128xf32>
    %2 = vector.broadcast %1 : vector<1x128xf32> to vector<32x128xf32>
    %3 = arith.mulf %0, %2 : vector<32x128xf32>
    %c0_3 = arith.constant 0 : index
    %c0_4 = arith.constant 0 : index
    %4 = vector.load %arg3[%c0_3, %c0_4] : memref<128x128xf32, #tpu.memory_space<vmem>>, vector<128x128xf32>
    %cst = arith.constant dense<0.000000e+00> : vector<32x128xf32>
    %5 = tpu.matmul %3, %4, %cst {dimension_numbers = #tpu.dot_dimension_numbers<[1], [0], [0], [1], [0, 0, 1, 1], [], []>} : vector<32x128xf32>, vector<128x128xf32>, vector<32x128xf32> -> vector<32x128xf32>
    %c0_5 = arith.constant 0 : index
    %c0_6 = arith.constant 0 : index
    %6 = vector.load %arg4[%c0_5, %c0_6] : memref<1x128xf32, #tpu.memory_space<vmem>>, vector<1x128xf32>
    %7 = vector.broadcast %6 : vector<1x128xf32> to vector<32x128xf32>
    %8 = arith.addf %5, %7 : vector<32x128xf32>
    %9 = math.tanh %8 : vector<32x128xf32>
    %c0_7 = arith.constant 0 : index
    %c0_8 = arith.constant 0 : index
    %10 = vector.load %arg1[%c0_7, %c0_8] : memref<32x128xf32, #tpu.memory_space<vmem>>, vector<32x128xf32>
    %11 = arith.addf %9, %10 : vector<32x128xf32>
    %c0_9 = arith.constant 0 : index
    %c0_10 = arith.constant 0 : index
    %12 = vector.load %arg5[%c0_9, %c0_10] : memref<32x128xf32, #tpu.memory_space<vmem>>, vector<32x128xf32>
    tpu.vector_store %arg5[%c0_9, %c0_10], %11 {strides = array<i32>} : memref<32x128xf32, #tpu.memory_space<vmem>>, vector<32x128xf32>,
    return
  }
  func.func @transform_0(%arg0: i32) -> (i32, i32) {
    %c0_i32 = arith.constant 0 : i32
    %c0_i32_0 = arith.constant 0 : i32
    return %arg0, %c0_i32 : i32, i32
  }
  func.func @transform_1(%arg0: i32) -> (i32, i32) {
    %c0_i32 = arith.constant 0 : i32
    %c0_i32_0 = arith.constant 0 : i32
    %c0_i32_1 = arith.constant 0 : i32
    return %c0_i32, %c0_i32_0 : i32, i32
  }
  func.func @transform_2(%arg0: i32) -> (i32, i32) {
    %c0_i32 = arith.constant 0 : i32
    %c0_i32_0 = arith.constant 0 : i32
    %c0_i32_1 = arith.constant 0 : i32
    return %c0_i32, %c0_i32_0 : i32, i32
  }
  func.func @transform_3(%arg0: i32) -> (i32, i32) {
    %c0_i32 = arith.constant 0 : i32
    %c0_i32_0 = arith.constant 0 : i32
    %c0_i32_1 = arith.constant 0 : i32
    return %c0_i32, %c0_i32_0 : i32, i32
  }
  func.func @transform_4(%arg0: i32) -> (i32, i32) {
    %c0_i32 = arith.constant 0 : i32
    %c0_i32_0 = arith.constant 0 : i32
    return %arg0, %c0_i32 : i32, i32
  }
}

</mosaic_0001>

<bundles_post_ra>
// kernel: tpu_custom_call.1
= control target key start
LH: loop header
LB: loop body
LE: loop exit
PB: predicated region body
PF: predicated region fallthrough
CT: control target
= control target key end

     0   :  { %9 = vsyncpa [#allocation3], 0  ;;  %s1053_s0 = inlined_call_operand.hbm [shape: f32[64,128], index: 0, kind: input, shape index: {}]   ;;  %s1054_s1 = inlined_call_operand.vmem [shape: f32[1,128], index: 1, kind: input, shape index: {}]   ;;  %s1055_s2 = inlined_call_operand.hbm [shape: f32[128,128], index: 2, kind: input, shape index: {}]   ;;  %s1056_s3 = inlined_call_operand.vmem [shape: f32[1,128], index: 3, kind: input, shape index: {}]   ;;  %s1057_s4 = inlined_call_operand.hbm [shape: f32[64,128], index: 4, kind: output, shape index: {}]  }
   0x1   :  { %11 = vsyncpa [#allocation3 + $0x1], 0 }
   0x2   :  { %12 = vsyncpa [#allocation6], 0 }
   0x3   :  { %13 = vsyncpa [#allocation4], 0 }
   0x4   :  { %15 = vsyncpa [#allocation4 + $0x1], 0  ;;  %s822_s15 = smov 0   ;;  %s824_s16 = smov 0  }
   0x5   :  { %s826_s17 = smov 0   ;;  %s828_s18 = smov 0  }
   0x6 LB: > { %s843_s19 = sadd.s32 4294967295, %s788_s18   ;;  %s465_s20 = sadd.s32 4294967294, %s788_s18   ;;  %s788_s18 = sphi %s828_s18, %s1077_s18   ;;  %s784_s17 = sphi %s826_s17, %s1076_s17   ;;  %s780_s16 = sphi %s824_s16, %s1075_s16   ;;  %s776_s15 = sphi %s822_s15, %s1074_s15  }
   0x7   : > { %p41_p0 = scmp.ne.s32.totalorder %s780_s16, %s776_s15  ;;  %p1058_p1 = scmp.eq.s32.totalorder %s843_s19, 0 }
   0x8   : > { %p134_p3 = scmp.eq.s32.totalorder %s465_s20, 1  ;;  %p466_p5 = scmp.ge.s32.totalorder %s788_s18, 1 }
   0x9   : > { %p852_p4 = por %p1058_p1, %p41_p0  ;;  %p141_p7 = scmp.lt.s32.totalorder %s788_s18, 3 }
   0xa   : > { %p857_p6 = por %p134_p3, %p41_p0  ;;  %s790_s24 = smov [#allocation5]  }
   0xb   : > { %s1061_s21 = scalar_select %p852_p4, 1, 0 }
   0xc   : > { %s1062_s22 = scalar_select %p857_p6, 1, 0 }
   0xd   : > { %p862_p8 = pnand %p466_p5, %p141_p7  ;;  %s156_s25 = sshll.u32 %s790_s24, 4  ;;  %s866_s25 = int_to_ptr.vmem [resolvable:$true] %s156_s25 }
   0xe   : > { %s878_s27 = sadd.s32 1, %s788_s18   ;;  %s28_s28 = sadd.s32 1, %s784_s17 }
   0xf   : > { %s1063_s23 = scalar_select %p862_p8, 1, 0 }
  0x10   : > { %p599_p9 = pneg %p862_p8  ;;  %s25_s29 = ssub.s32 %s788_s18, %s878_s27 }
  0x11   : > { %s660_s6 = scalar_lea.hbm %s1055_s2, 2048 }
  0x12   : > { %p873_p11 = pnand %p599_p9, %p1058_p1  ;;  %p661_p12 = scmp.ne.s32.totalorder %s1055_s2, %s660_s6 }
  0x13   : > { %p667_p5 = scmp.lt.u32.totalorder %s660_s6, %s1055_s2 }
  0x14   : > { %p662_p13 = pneg %p873_p11 }
  0x16   : > { %p663_p0 = pnand %p662_p13, %p661_p12 }
  0x18   : > { %p664_p3 = pneg %p663_p0 }
  0x1a   : > { %p669_p7 = pnand %p667_p5, %p664_p3 }
  0x1c   : > { %672 = shalt.err (!%p669_p7)
}
  0x1d   : > { %s673_s11 = scalar_lea.vmem %s866_s25, 2048  ;;  %p681_p2 = scmp.lt.s32.totalorder %s866_s25, %s866_s25 }
  0x1e   : > { %p674_p9 = scmp.ne.s32.totalorder %s866_s25, %s673_s11  ;;  %p682_p6 = scmp.lt.s32.totalorder %s673_s11, %s673_s11 }
  0x20   : > { %p676_p10 = pnand %p674_p9, %p662_p13  ;;  %p683_p4 = por %p682_p6, %p681_p2 }
  0x22   : > { %p677_p1 = pneg %p676_p10 }
  0x24   : > { %p684_p8 = pnand %p683_p4, %p677_p1 }
  0x26   : > { %687 = shalt.err (!%p684_p8)
}
  0x27   : > { %s791_s12 = smov 128   ;;  %s792_s13 = smov 8  }
  0x28   : > { %602 = dma.hbm_to_vmem [thread:$0]  (!%p873_p11), %s1055_s2, 2048, %s866_s25, [#allocation6], %s791_s12, %s791_s12, %s792_s13  }
  0x29   : > { %p26_p1 = scmp.eq.s32.totalorder %s25_s29, 0  ;;  %p35_p2 = scmp.ne.s32.totalorder %s784_s17, %s780_s16 }
  0x2a   : > { %p36_p4 = scmp.eq.s32.totalorder %s788_s18, 0  ;;  %p612_p6 = scmp.lt.s32.totalorder %s788_s18, 2 }
  0x2b   : > { %s912_s24 = scalar_select %p26_p1, %s784_s17, %s28_s28  }
  0x2c   : > { %p37_p8 = por %p36_p4, %p35_p2  ;;  %p1065_p10 = scmp.eq.s32.totalorder %s843_s19, 1 }
  0x2d   : > { %s173_s26 = sand.u32 1, %s784_s17   ;;  %s483_s5 = sshll.u32 %s788_s18, 9 }
  0x2e   : > { %p916_p12 = por %p1065_p10, %p35_p2  ;;  %s469_s6 = sshll.u32 %s173_s26, 5 }
  0x2f   : > { %s925_s9 = scalar_lea.hbm %s1053_s0, %s483_s5  ;;  %s177_s25 = scalar_lea.vmem [#allocation2], %s469_s6 }
  0x30   : > { %s184_s28 = sshll.u32 %s177_s25, 4  ;;  %p927_p11 = pnand %p612_p6, %p37_p8  ;;  %s931_s28 = int_to_ptr.vmem [resolvable:$true] %s184_s28 }
  0x31   : > { %s933_s10 = scalar_lea.sflag [#allocation3], %s173_s26  ;;  %s688_s11 = scalar_lea.hbm %s925_s9, 512 }
  0x32   : > { %p689_p13 = scmp.ne.s32.totalorder %s925_s9, %s688_s11  ;;  %p690_p0 = pneg %p927_p11 }
  0x33   : > { %s693_s5 = scalar_lea.hbm %s1053_s0, 1024  ;;  %p694_p7 = scmp.lt.u32.totalorder %s925_s9, %s1053_s0 }
  0x34   : > { %p691_p3 = pnand %p690_p0, %p689_p13  ;;  %p695_p9 = scmp.lt.u32.totalorder %s693_s5, %s688_s11 }
  0x35   : > { %p697_p2 = scmp.lt.u32.totalorder %s688_s11, %s925_s9 }
  0x36   : > { %p692_p5 = pneg %p691_p3  ;;  %p696_p1 = por %p695_p9, %p694_p7 }
  0x38   : > { %p698_p4 = por %p697_p2, %p696_p1 }
  0x3a   : > { %p699_p6 = pnand %p698_p4, %p692_p5 }
  0x3c   : > { %702 = shalt.err (!%p699_p6)
}
  0x3d   : > { %s703_s26 = scalar_lea.vmem %s931_s28, 512  ;;  %s793_s8 = smov [#allocation2]  }
  0x3e   : > { %p704_p8 = scmp.ne.s32.totalorder %s931_s28, %s703_s26  ;;  %s708_s25 = sshll.u32 %s793_s8, 4  ;;  %s709_s25 = int_to_ptr.vmem [resolvable:$false] %s708_s25 }
  0x3f   : > { %s710_s14 = scalar_lea.vmem %s709_s25, 1024  ;;  %p711_p3 = scmp.lt.s32.totalorder %s931_s28, %s709_s25 }
  0x40   : > { %p706_p10 = pnand %p704_p8, %p690_p0  ;;  %p712_p7 = scmp.lt.s32.totalorder %s710_s14, %s703_s26 }
  0x42   : > { %p707_p13 = pneg %p706_p10  ;;  %p713_p9 = por %p712_p7, %p711_p3 }
  0x44   : > { %p714_p1 = pnand %p713_p9, %p707_p13 }
  0x46   : > { %717 = shalt.err (!%p714_p1)
}
  0x47   : > { %606 = dma.hbm_to_vmem [thread:$0]  (!%p927_p11), %s925_s9, 512, %s931_s28, %s933_s10, %s791_s12, %s791_s12, %s792_s13  }
  0x48   : > { %p1068_p0 = scmp.ne.s32.totalorder %s1063_s23, 0 }
  0x49   : > { %s967_s11 = sand.u32 (!%p1068_p0), 1, %s780_s16   ;;  %p1069_p5 = scmp.ne.s32.totalorder (!%p1068_p0), %s1061_s21, 0 }
  0x4a   : > { %196 = sbr.rel (%p1068_p0) target bundleno = 365 (0x16d), region = 36  ;;  %s473_s20 = sshll.u32 (!%p1068_p0), %s967_s11, 5 }
  0x4b   : > { %s199_s5 = scalar_lea.sflag (!%p1068_p0), [#allocation3], %s967_s11  ;;  %s973_s29 = scalar_lea.vmem (!%p1068_p0), [#allocation2], %s473_s20 }
  0x51   : > { %763 = dma.done.wait (%p1069_p5), %s199_s5, 512  }
  0x52   : > { %765 = vsyncadd (%p1069_p5), %s199_s5, 4294966784  ;;  %p1070_p11 = scmp.eq.s32.totalorder %s843_s19, 0 }
  0x54   : > { %767 = dma.done.wait (%p1070_p11), [#allocation6], 2048   ;;  %p1071_p2 = pmov %p1070_p11 }
  0x55   : > { %v248_v0 = vld [vmem:[#allocation5] sm:$0xff]  ;;  %v249_v1 = vld [vmem:[#allocation5 + $0x8] sm:$0xff]  ;;  %v250_v2 = vld [vmem:[#allocation5 + $0x10] sm:$0xff]  ;;  %s484_s9 = sshll.u32 %s843_s19, 9  ;;  %s230_s28 = scalar_lea.vmem [#allocation7], %s473_s20 }
  0x56   : > { %769 = vsyncadd (%p1071_p2), [#allocation6], 4294965248  ;;  %v543_v3 = vpack.c.bf16 %v249_v1, %v248_v0  ;;  %v251_v4 = vld [vmem:[#allocation5 + $0x18] sm:$0xff]  ;;  %v252_v6 = vld [vmem:[#allocation5 + $0x20] sm:$0xff]  ;;  %s382_s10 = sshll.u32 %s230_s28, 4  ;;  %s1006_s26 = scalar_lea.hbm %s1057_s4, %s484_s9  ;;  %s1008_s10 = int_to_ptr.vmem [resolvable:$true] %s382_s10 }
  0x57   : > { %v547_v5 = vpack.c.bf16 %v251_v4, %v250_v2  ;;  %v253_v7 = vld [vmem:[#allocation5 + $0x28] sm:$0xff]  ;;  %v984_v9 = vld [vmem:[%s973_s29] sm:$0xff]  ;;  %v254_v11 = vld [vmem:[#allocation5 + $0x30] sm:$0xff]  ;;  %s369_s19 = scalar_lea.sflag [#allocation4], %s967_s11  ;;  %s718_s8 = scalar_lea.vmem %s1008_s10, 512 }
  0x58   : > { %544 = vmatprep.subr.bf16.mxu0 %v543_v3  ;;  %575 = vmatprep.subr.bf16.mxu1 %v543_v3  ;;  %v551_v8 = vpack.c.bf16 %v253_v7, %v252_v6  ;;  %v476_v10 = vld [vmem:[%s1054_s1] ss:$0 sm:$0xff]  ;;  %v255_v12 = vld [vmem:[#allocation5 + $0x38] sm:$0xff]  ;;  %v991_v14 = vld [vmem:[%s973_s29 + $0x10] sm:$0xff]  ;;  %p719_p4 = scmp.ne.s32.totalorder %s1008_s10, %s718_s8  ;;  %s794_s25 = smov [#allocation7]  }
  0x59   : > { %546 = vmatpush3.bf16.msra.mxu0 %v543_v3  ;;  %583 = vmatpush3.bf16.msra.mxu1 %v543_v3  ;;  %v244_v13 = vmul.f32 %v476_v10, %v984_v9  ;;  %v246_v15 = vmul.f32 %v476_v10, %v991_v14  ;;  %v555_v16 = vpack.c.bf16 %v255_v12, %v254_v11  ;;  %v256_v17 = vld [vmem:[#allocation5 + $0x40] sm:$0xff]  ;;  %v257_v18 = vld [vmem:[#allocation5 + $0x48] sm:$0xff]  ;;  %v258_v20 = vld [vmem:[#allocation5 + $0x50] sm:$0xff]  ;;  %s722_s14 = sshll.u32 %s794_s25, 4  ;;  %s723_s14 = int_to_ptr.vmem [resolvable:$false] %s722_s14 }
  0x5a   : > { %548 = vmatprep.subr.bf16.mxu0 %v547_v5  ;;  %576 = vmatprep.subr.bf16.mxu1 %v547_v5  ;;  %v559_v19 = vpack.c.bf16 %v257_v18, %v256_v17  ;;  %v259_v21 = vld [vmem:[#allocation5 + $0x58] sm:$0xff]  ;;  %v260_v23 = vld [vmem:[#allocation5 + $0x60] sm:$0xff]  ;;  %v261_v24 = vld [vmem:[#allocation5 + $0x68] sm:$0xff]  ;;  %p720_p6 = pnand %p719_p4, %p916_p12  ;;  %s724_s20 = scalar_lea.vmem %s723_s14, 1024 }
  0x5b   : > { %537 = vmatprep.mubr.f32.mxu0 %v244_v13  ;;  %540 = vmatprep.mubr.f32.mxu1 %v246_v15  ;;  %v563_v22 = vpack.c.bf16 %v259_v21, %v258_v20  ;;  %v567_v25 = vpack.c.bf16 %v261_v24, %v260_v23  ;;  %v262_v26 = vld [vmem:[#allocation5 + $0x70] sm:$0xff]  ;;  %v263_v27 = vld [vmem:[#allocation5 + $0x78] sm:$0xff]  ;;  %v234_v29 = vld [vmem:[%s973_s29 + $0x8] sm:$0xff]  ;;  %p725_p10 = scmp.lt.s32.totalorder %s1008_s10, %s723_s14  ;;  %p726_p13 = scmp.lt.s32.totalorder %s724_s20, %s718_s8 }
  0x5c   : > { %v571_v28 = vpack.c.bf16 %v263_v27, %v262_v26  ;;  %v236_v30 = vld [vmem:[%s973_s29 + $0x18] sm:$0xff]  ;;  %v245_v31 = vmul.f32 %v476_v10, %v234_v29  ;;  %v477_v33 = vld [vmem:[%s1056_s3] ss:$0 sm:$0xff]  ;;  %p721_p8 = pneg %p720_p6 }
  0x5d   : > { %550 = vmatpush3.bf16.msra.mxu0 %v547_v5  ;;  %584 = vmatpush3.bf16.msra.mxu1 %v547_v5  ;;  %v247_v32 = vmul.f32 %v476_v10, %v236_v30  ;;  %p727_p3 = por %p726_p13, %p725_p10 }
  0x5e   : > { %552 = vmatprep.subr.bf16.mxu0 %v551_v8  ;;  %577 = vmatprep.subr.bf16.mxu1 %v551_v8 }
  0x5f   : > { %p728_p7 = pnand %p727_p3, %p721_p8 }
  0x61   : > { %554 = vmatpush3.bf16.msra.mxu0 %v551_v8  ;;  %585 = vmatpush3.bf16.msra.mxu1 %v551_v8 }
  0x62   : > { %556 = vmatprep.subr.bf16.mxu0 %v555_v16  ;;  %578 = vmatprep.subr.bf16.mxu1 %v555_v16 }
  0x65   : > { %558 = vmatpush3.bf16.msra.mxu0 %v555_v16  ;;  %586 = vmatpush3.bf16.msra.mxu1 %v555_v16 }
  0x66   : > { %560 = vmatprep.subr.bf16.mxu0 %v559_v19  ;;  %579 = vmatprep.subr.bf16.mxu1 %v559_v19 }
  0x69   : > { %562 = vmatpush3.bf16.msra.mxu0 %v559_v19  ;;  %587 = vmatpush3.bf16.msra.mxu1 %v559_v19 }
  0x6a   : > { %564 = vmatprep.subr.bf16.mxu0 %v563_v22  ;;  %580 = vmatprep.subr.bf16.mxu1 %v563_v22 }
  0x6d   : > { %566 = vmatpush3.bf16.msra.mxu0 %v563_v22  ;;  %588 = vmatpush3.bf16.msra.mxu1 %v563_v22 }
  0x6e   : > { %568 = vmatprep.subr.bf16.mxu0 %v567_v25  ;;  %581 = vmatprep.subr.bf16.mxu1 %v567_v25 }
  0x71   : > { %570 = vmatpush3.bf16.msra.mxu0 %v567_v25  ;;  %589 = vmatpush3.bf16.msra.mxu1 %v567_v25 }
  0x72   : > { %572 = vmatprep.subr.bf16.mxu0 %v571_v28  ;;  %582 = vmatprep.subr.bf16.mxu1 %v571_v28 }
  0x75   : > { %574 = vmatpush3.bf16.msra.mxu0 %v571_v28  ;;  %590 = vmatpush3.bf16.msra.mxu1 %v571_v28 }
  0x78   : > { %538 = vmatmul.mubr.f32.vlgmr.msra.gmra.mrb[0].mxu0 %v245_v31  ;;  %541 = vmatmul.mubr.f32.vlgmr.msra.gmra.mrb[0].mxu1 %v247_v32 }
 0x14b   : > { %v539_v34 = vpop.f32.mrb[0].mxu0  ;;  %v542_v35 = vpop.f32.mrb[0].mxu1 }
 0x14c   : > { %v343_v36 = vadd.f32 %v539_v34, %v477_v33  ;;  %v353_v37 = vadd.f32 %v542_v35, %v477_v33  ;;  %v337_v38 = vpop.f32.mrb[1].mxu0  ;;  %v347_v39 = vpop.f32.mrb[1].mxu1 }
 0x14d   : > { %v338_v40 = vadd.f32 %v477_v33, %v337_v38  ;;  %v348_v41 = vadd.f32 %v477_v33, %v347_v39 }
 0x14e   : > { %652 = vtanh.f32 %v343_v36 }
 0x14f   : > { %654 = vtanh.f32 %v353_v37 }
 0x150   : > { %656 = vtanh.f32 %v338_v40 }
 0x151   : > { %658 = vtanh.f32 %v348_v41 }
 0x158   : > { %v653_v42 = vpop.eup %652 }
 0x159   : > { %v655_v43 = vpop.eup %654  ;;  %v361_v44 = vadd.f32 %v653_v42, %v234_v29 }
 0x15a   : > { %v657_v45 = vpop.eup %656  ;;  %v363_v46 = vadd.f32 %v655_v43, %v236_v30 }
 0x15b   : > { %v659_v47 = vpop.eup %658  ;;  %365 = vst [vmem:[%s230_s28 + $0x8] sm:$0xff] %v361_v44  ;;  %v360_v48 = vadd.f32 %v657_v45, %v984_v9 }
 0x15c   : > { %367 = vst [vmem:[%s230_s28 + $0x18] sm:$0xff] %v363_v46  ;;  %v362_v49 = vadd.f32 %v659_v47, %v991_v14 }
 0x15d   : > { %364 = vst [vmem:[%s230_s28] sm:$0xff] %v360_v48 }
 0x15e   : > { %366 = vst [vmem:[%s230_s28 + $0x10] sm:$0xff] %v362_v49 }
 0x15f   : > { %731 = shalt.err (!%p728_p7)
}
 0x160   : > { %s732_s5 = scalar_lea.hbm %s1006_s26, 512  ;;  %s736_s23 = scalar_lea.hbm %s1057_s4, 1024 }
 0x161   : > { %p733_p9 = scmp.ne.s32.totalorder %s1006_s26, %s732_s5  ;;  %p737_p5 = scmp.lt.u32.totalorder %s1006_s26, %s1057_s4 }
 0x162   : > { %p738_p11 = scmp.lt.u32.totalorder %s736_s23, %s732_s5  ;;  %p740_p4 = scmp.lt.u32.totalorder %s732_s5, %s1006_s26 }
 0x163   : > { %p734_p1 = pnand %p733_p9, %p916_p12 }
 0x164   : > { %p739_p2 = por %p738_p11, %p737_p5 }
 0x165   : > { %p735_p0 = pneg %p734_p1 }
 0x166   : > { %p741_p6 = por %p740_p4, %p739_p2 }
 0x168   : > { %p742_p8 = pnand %p741_p6, %p735_p0 }
 0x16a   : > { %745 = shalt.err (!%p742_p8)
}
 0x16b   : > { %s795_s9 = smov 128   ;;  %s796_s28 = smov 8  }
 0x16c   : > { %597 = dma.vmem_to_hbm [thread:$0]  (%p916_p12), %s1008_s10, 512, %s1006_s26, %s369_s19, %s795_s9, %s795_s9, %s796_s28  }
 0x16d PF: > { %s397_s6 = sand.u32 1, %s776_s15   ;;  %p1072_p10 = scmp.ne.s32.totalorder %s1062_s22, 0 }
 0x16e   : > { %p1073_p13 = scmp.ge.s32.totalorder %s788_s18, 2  ;;  %s398_s7 = scalar_lea.sflag [#allocation4], %s397_s6 }
 0x170   : > { %p608_p3 = pnand %p1073_p13, %p1072_p10 }
 0x172   : > { %771 = dma.done.wait (!%p608_p3), %s398_s7, 512  }
 0x173   : > { %773 = vsyncadd (!%p608_p3), %s398_s7, 4294966784  ;;  %p18_p7 = scmp.ge.s32.totalorder %s878_s27, 4   ;;  %s1074_s15 = smov %s780_s16 }
 0x174   : > { %s1075_s16 = smov %s784_s17  ;;  %s1076_s17 = smov %s912_s24 }
 0x175   : > { %s1077_s18 = smov %s878_s27  ;;  %20 = sbr.rel (!%p18_p7) target bundleno = 6 (0x6), region = 85 }
 0x17c   :  { %403 = vsyncpa [#allocation3], 1 }
 0x17d   :  { %405 = vsyncpa [#allocation3 + $0x1], 1 }
 0x17e   :  { %406 = vsyncpa [#allocation6], 1 }
 0x17f   :  { %407 = vsyncpa [#allocation4], 1 }
 0x180   :  { %409 = vsyncpa [#allocation4 + $0x1], 1 }

</bundles_post_ra>
